<compile_context>
chip_gen: v7x
topology: tpu7x:2x2x1
jax: 0.10.0
libtpu: 0.0.40
codegen_flags: <defaults>
</compile_context>

<pallas_src>
import functools

import numpy as np
import jax
import jax.numpy as jnp
from jax.experimental import pallas as pl
from jax.experimental.pallas import tpu as pltpu

BF16 = jnp.bfloat16
F32 = jnp.float32

_BLOCKS = (3, 8, 36, 3)          # ResNet-152
_PLANES = (64, 128, 256, 512)
_EXP = 4

_VMEM_LIMIT = 48 * 1024 * 1024   # explicit scoped-VMEM budget (above v5e's 16 MiB default,
                                 # below v7x's 64 MiB physical)


def _ru(x, m):
    return (x + m - 1) // m * m


# ---------------------------------------------------------------------------
# GEMM kernel: out = act((x @ w) * scale + shift [+ residual])
# Weight / scale / shift blocks are the full arrays with a constant block index, so they are
# DMA'd into VMEM once per call; the grid tiles only M.
# ---------------------------------------------------------------------------
def _gemm_kernel(x_ref, w_ref, s_ref, b_ref, o_ref, *, relu):
    acc = jnp.dot(x_ref[...], w_ref[...], preferred_element_type=jnp.float32)
    out = acc * s_ref[...] + b_ref[...]
    if relu:
        out = jnp.maximum(out, 0.0)
    o_ref[...] = out.astype(o_ref.dtype)


def _gemm_add_kernel(x_ref, w_ref, s_ref, b_ref, r_ref, o_ref, *, relu):
    acc = jnp.dot(x_ref[...], w_ref[...], preferred_element_type=jnp.float32)
    out = acc * s_ref[...] + b_ref[...] + r_ref[...].astype(jnp.float32)
    if relu:
        out = jnp.maximum(out, 0.0)
    o_ref[...] = out.astype(o_ref.dtype)


@functools.lru_cache(maxsize=None)
def _gemm_fn(M, K, N, relu, residual, out_dtype_name):
    Mp = _ru(M, 8)
    tm = 512 if K <= 1152 else 256     # large tiles for the low-K 1x1 convs, 256 for big-K im2col GEMMs
    tm = min(tm, Mp)
    grid = (pl.cdiv(Mp, tm),)
    kern = functools.partial(_gemm_add_kernel if residual else _gemm_kernel, relu=relu)
    in_specs = [
        pl.BlockSpec((tm, K), lambda i: (i, 0)),
        pl.BlockSpec((K, N), lambda i: (0, 0)),     # full weight, constant index -> fetched once
        pl.BlockSpec((1, N), lambda i: (0, 0)),
        pl.BlockSpec((1, N), lambda i: (0, 0)),
    ]
    if residual:
        in_specs.append(pl.BlockSpec((tm, N), lambda i: (i, 0)))
    call = pl.pallas_call(
        kern,
        out_shape=jax.ShapeDtypeStruct((Mp, N), jnp.dtype(out_dtype_name)),
        grid=grid,
        in_specs=in_specs,
        out_specs=pl.BlockSpec((tm, N), lambda i: (i, 0)),
        compiler_params=pltpu.CompilerParams(
            dimension_semantics=("parallel",),
            vmem_limit_bytes=_VMEM_LIMIT),
    )
    return jax.jit(call), Mp


def gemm(x, w, scale, shift, *, relu, residual=None, out_dtype=BF16):
    """y = act((x @ w) * scale + shift [+ residual]).  x:(M,K) w:(K,N) scale/shift:(1,N)."""
    M, K = x.shape
    N = w.shape[1]
    fn, Mp = _gemm_fn(M, K, N, bool(relu), residual is not None, jnp.dtype(out_dtype).name)
    xb = x.astype(BF16)
    if Mp != M:                      # only tiny (M < 8 / non-multiple-of-8) cases ever pad
        xb = jnp.pad(xb, ((0, Mp - M), (0, 0)))
    args = [xb, w.astype(BF16), scale.astype(F32), shift.astype(F32)]
    if residual is not None:
        rb = residual.astype(BF16)
        if Mp != M:
            rb = jnp.pad(rb, ((0, Mp - M), (0, 0)))
        args.append(rb)
    out = fn(*args)
    return out if Mp == M else out[:M]


def conv1x1(x, w, scale, shift, *, relu, residual=None, stride=1):
    """1x1 conv + folded-BN (+ residual + ReLU) on NHWC via the GEMM kernel."""
    if stride != 1:
        x = x[:, ::stride, ::stride, :]
    N, H, W, C = x.shape
    Cout = w.shape[1]
    rf = None if residual is None else residual.reshape(N * H * W, Cout)
    y = gemm(x.reshape(N * H * W, C), w, scale, shift, relu=relu, residual=rf)
    return y.reshape(N, H, W, Cout)


def _im2col(x, k, stride, pad):
    """Small plain-JAX im2col -- only used for the stem and the 3 stride-2 3x3 convs."""
    N, H, W, C = x.shape
    Ho = (H + 2 * pad - k) // stride + 1
    Wo = (W + 2 * pad - k) // stride + 1
    xp = jnp.pad(x, ((0, 0), (pad, pad), (pad, pad), (0, 0)))
    taps = []
    for dh in range(k):
        for dw in range(k):
            taps.append(xp[:, dh:dh + stride * (Ho - 1) + 1:stride,
                           dw:dw + stride * (Wo - 1) + 1:stride, :])
    pat = jnp.stack(taps, axis=3)                     # (N, Ho, Wo, k*k, C)
    return pat.reshape(N * Ho * Wo, k * k * C), (Ho, Wo)


# ---------------------------------------------------------------------------
# Fully fused stride-1 ResNet bottleneck block.
#
# Activations are flat (H*W, C) planes.  conv1/conv3 are single full-plane MXU dots.  The 3x3 conv
# uses a flat VMEM scratch of shape (HW + 2W + 2, Cmid): rows [0, W+1) and [W+1+HW, end) stay zero
# (the conv's row padding), the interior holds y1.  A tap (dh, dw) is then the contiguous row range
# starting at (W+1) + (dh-1)*W + (dw-1); column wrap-around at w==0 / w==W-1 is removed with a tiny
# precomputed per-row edge mask.  All 9 tap dots have M = H*W.
# ---------------------------------------------------------------------------
def _bneck_body(x, shortcut, mask_ref, w1_ref, s1_ref, b1_ref, w2_ref, s2_ref, b2_ref,
                w3_ref, s3_ref, b3_ref, o_ref, y1f_ref, HW, W):
    Cmid = w1_ref.shape[1]
    pad = W + 1

    # keep the (small) row-halo regions of the flat scratch zeroed; interior is overwritten below
    y1f_ref[0:pad, :] = jnp.zeros((pad, Cmid), y1f_ref.dtype)
    y1f_ref[pad + HW:, :] = jnp.zeros((pad, Cmid), y1f_ref.dtype)

    # conv1 (1x1) + BN + ReLU: one full-plane MXU dot
    a1 = jnp.dot(x, w1_ref[...], preferred_element_type=jnp.float32)
    y1f_ref[pad:pad + HW, :] = jnp.maximum(a1 * s1_ref[...] + b1_ref[...], 0.0).astype(y1f_ref.dtype)

    # conv2 (3x3, stride 1, pad 1): 9 full-plane taps via flat row shifts
    accs = []
    for dw in range(3):
        acc = None
        for dh in range(3):
            off = pad + (dh - 1) * W + (dw - 1)
            tap = y1f_ref[off:off + HW, :]
            d = jnp.dot(tap, w2_ref[dh, dw], preferred_element_type=jnp.float32)
            acc = d if acc is None else acc + d
        accs.append(acc)
    acc2 = accs[1] + accs[0] * mask_ref[:, 0:1] + accs[2] * mask_ref[:, 1:2]
    y2 = jnp.maximum(acc2 * s2_ref[...] + b2_ref[...], 0.0).astype(jnp.bfloat16)

    # conv3 (1x1) + BN + shortcut + ReLU: one full-plane MXU dot, fused fp32 epilogue
    a3 = jnp.dot(y2, w3_ref[...], preferred_element_type=jnp.float32)
    out = a3 * s3_ref[...] + b3_ref[...] + shortcut.astype(jnp.float32)
    o_ref[0] = jnp.maximum(out, 0.0).astype(o_ref.dtype)


def _bneck_id_kernel(mask_ref, x_ref, w1_ref, s1_ref, b1_ref, w2_ref, s2_ref, b2_ref,
                     w3_ref, s3_ref, b3_ref, o_ref, y1f_ref, *, HW, W):
    x = x_ref[0]                                   # identity shortcut read from x_ref (single DMA)
    _bneck_body(x, x, mask_ref, w1_ref, s1_ref, b1_ref, w2_ref, s2_ref, b2_ref,
                w3_ref, s3_ref, b3_ref, o_ref, y1f_ref, HW, W)


def _bneck_proj_kernel(mask_ref, x_ref, r_ref, w1_ref, s1_ref, b1_ref, w2_ref, s2_ref, b2_ref,
                       w3_ref, s3_ref, b3_ref, o_ref, y1f_ref, *, HW, W):
    _bneck_body(x_ref[0], r_ref[0], mask_ref, w1_ref, s1_ref, b1_ref, w2_ref, s2_ref, b2_ref,
                w3_ref, s3_ref, b3_ref, o_ref, y1f_ref, HW, W)


@functools.lru_cache(maxsize=None)
def _conv2_edge_mask(H, W):
    w_idx = np.arange(H * W) % W
    m = np.stack([(w_idx != 0), (w_idx != W - 1)], axis=1).astype(np.float32)
    return jnp.asarray(m)                          # (H*W, 2): [left-tap valid, right-tap valid]


@functools.lru_cache(maxsize=None)
def _bneck_fn(Nb, HW, W, Cin, Cmid, Cout, has_residual):
    def act(c):
        return pl.BlockSpec((1, HW, c), lambda n: (n, 0, 0))

    def rep(shape):
        nd = len(shape)
        return pl.BlockSpec(shape, lambda n, nd=nd: (0,) * nd)

    kern = functools.partial(_bneck_proj_kernel if has_residual else _bneck_id_kernel, HW=HW, W=W)
    in_specs = [rep((HW, 2)), act(Cin)]
    if has_residual:
        in_specs.append(act(Cout))
    in_specs += [rep((Cin, Cmid)), rep((1, Cmid)), rep((1, Cmid)),
                 rep((3, 3, Cmid, Cmid)), rep((1, Cmid)), rep((1, Cmid)),
                 rep((Cmid, Cout)), rep((1, Cout)), rep((1, Cout))]
    call = pl.pallas_call(
        kern,
        out_shape=jax.ShapeDtypeStruct((Nb, HW, Cout), BF16),
        grid=(Nb,),
        in_specs=in_specs,
        out_specs=act(Cout),
        scratch_shapes=[pltpu.VMEM((HW + 2 * W + 2, Cmid), BF16)],
        compiler_params=pltpu.CompilerParams(
            dimension_semantics=("parallel",),
            vmem_limit_bytes=_VMEM_LIMIT),
    )
    return jax.jit(call)


def bottleneck_flat(xf, H, W, blk, residual_flat=None):
    """Fused stride-1 bottleneck on flat (N, H*W, C) activations."""
    Nb, HW, Cin = xf.shape
    Cmid = blk['w1'].shape[1]
    Cout = blk['w3'].shape[1]
    if residual_flat is None:
        assert Cin == Cout, "identity-shortcut block requires Cin == Cout"
    fn = _bneck_fn(Nb, HW, W, Cin, Cmid, Cout, residual_flat is not None)
    args = [_conv2_edge_mask(H, W), xf]
    if residual_flat is not None:
        args.append(residual_flat)
    args += [blk['w1'], blk['s1'], blk['b1'], blk['w2'], blk['s2'], blk['b2'],
             blk['w3'], blk['s3'], blk['b3']]
    return fn(*args)


def bottleneck_block(x, blk, residual=None):
    """NHWC convenience wrapper around bottleneck_flat."""
    N, H, W, Cin = x.shape
    Cout = blk['w3'].shape[1]
    rf = None if residual is None else residual.reshape(N, H * W, Cout)
    yf = bottleneck_flat(x.reshape(N, H * W, Cin), H, W, blk, rf)
    return yf.reshape(N, H, W, Cout)


# ---------------------------------------------------------------------------
# 3x3 / stride-2 / pad-1 max pool (stem).  The even/odd column phases are packed into the channel
# dim by a free host reshape; padding and row/column phase combination happen inside the kernel.
# ---------------------------------------------------------------------------
def _maxpool_kernel(x_ref, o_ref):
    xv = x_ref[0]                                   # (H, Wo, 2*C): [:C] = col 2wo, [C:] = col 2wo+1
    H, Wo, C2 = xv.shape
    C = C2 // 2
    Ho = H // 2
    even = xv[:, :, :C]
    odd = xv[:, :, C:]
    prev_odd = jnp.concatenate(
        [jnp.full((H, 1, C), -jnp.inf, xv.dtype), odd[:, :Wo - 1, :]], axis=1)   # col 2wo-1
    colmax = jnp.maximum(jnp.maximum(even, odd), prev_odd)                       # (H, Wo, C)
    cm = colmax.reshape(Ho, 2, Wo, C)
    a = cm[:, 0]                                    # row 2h
    b = cm[:, 1]                                    # row 2h+1
    prev_b = jnp.concatenate(
        [jnp.full((1, Wo, C), -jnp.inf, colmax.dtype), b[:Ho - 1]], axis=0)      # row 2h-1
    o_ref[0] = jnp.maximum(jnp.maximum(a, b), prev_b).astype(o_ref.dtype)


@functools.lru_cache(maxsize=None)
def _maxpool_fn(N, H, Wo, C):
    Ho = H // 2
    call = pl.pallas_call(
        _maxpool_kernel,
        out_shape=jax.ShapeDtypeStruct((N, Ho, Wo, C), BF16),
        grid=(N,),
        in_specs=[pl.BlockSpec((1, H, Wo, 2 * C), lambda n: (n, 0, 0, 0))],
        out_specs=pl.BlockSpec((1, Ho, Wo, C), lambda n: (n, 0, 0, 0)),
        compiler_params=pltpu.CompilerParams(dimension_semantics=("parallel",)),
    )
    return jax.jit(call)


def maxpool3x3s2(x):
    """PyTorch MaxPool2d(kernel=3, stride=2, padding=1) on NHWC (even H, W)."""
    x = x.astype(BF16)
    N, H, W, C = x.shape
    assert H % 2 == 0 and W % 2 == 0, "stem max pool expects even spatial dims"
    Wo = W // 2
    xr = x.reshape(N, H, Wo, 2 * C)                 # free reshape: packs column phases into channels
    return _maxpool_fn(N, H, Wo, C)(xr)


# ---------------------------------------------------------------------------
# Fused head: global average pool + fc1 + ReLU + fc2
# ---------------------------------------------------------------------------
def _head_kernel(x_ref, w1_ref, b1_ref, w2_ref, b2_ref, o_ref):
    feat = jnp.mean(x_ref[...].astype(jnp.float32), axis=1)            # (N, C) global avg pool
    h = jnp.dot(feat.astype(jnp.bfloat16), w1_ref[...], preferred_element_type=jnp.float32)
    h = jnp.maximum(h + b1_ref[...], 0.0)
    out = jnp.dot(h.astype(jnp.bfloat16), w2_ref[...], preferred_element_type=jnp.float32)
    o_ref[...] = (out + b2_ref[...]).astype(o_ref.dtype)


@functools.lru_cache(maxsize=None)
def _head_fn(N, HW, C, D1, D2):
    call = pl.pallas_call(
        _head_kernel,
        out_shape=jax.ShapeDtypeStruct((N, D2), F32),
        grid=(1,),
        in_specs=[pl.BlockSpec((N, HW, C), lambda i: (0, 0, 0)),
                  pl.BlockSpec((C, D1), lambda i: (0, 0)),
                  pl.BlockSpec((1, D1), lambda i: (0, 0)),
                  pl.BlockSpec((D1, D2), lambda i: (0, 0)),
                  pl.BlockSpec((1, D2), lambda i: (0, 0))],
        out_specs=pl.BlockSpec((N, D2), lambda i: (0, 0)),
        compiler_params=pltpu.CompilerParams(vmem_limit_bytes=_VMEM_LIMIT),
    )
    return jax.jit(call)


def head(y_nhwc, fc1, fc2):
    N, H, W, C = y_nhwc.shape
    w1, b1 = fc1
    w2, b2 = fc2
    fn = _head_fn(N, H * W, C, w1.shape[1], w2.shape[1])
    return fn(y_nhwc.reshape(N, H * W, C), w1, b1, w2, b2)


# ---------------------------------------------------------------------------
# Synthetic ResNet-152 parameters (pretrained weights unavailable; BN folded)
# ---------------------------------------------------------------------------
def init_params(seed=0):
    rng = np.random.default_rng(seed)

    def he(shape, fan_in):
        w = rng.standard_normal(shape, dtype=np.float32) * np.sqrt(2.0 / fan_in)
        return jnp.asarray(w, dtype=BF16)

    def bn(c, gain=1.0):
        s = gain * (1.0 + 0.1 * rng.standard_normal((1, c), dtype=np.float32))
        t = 0.05 * rng.standard_normal((1, c), dtype=np.float32)
        return jnp.asarray(s, dtype=F32), jnp.asarray(t, dtype=F32)

    # stem 7x7x3x64; the grayscale->3 channel repeat is folded in (sum over input channels, K 147->49)
    w0 = rng.standard_normal((7, 7, 3, 64), dtype=np.float32) * np.sqrt(2.0 / (7 * 7 * 3))
    w_stem = jnp.asarray(w0.sum(axis=2).reshape(49, 64), dtype=BF16)
    params = {'stem': (w_stem,) + bn(64)}

    layers = []
    cin = 64
    for planes, nblocks in zip(_PLANES, _BLOCKS):
        cout = planes * _EXP
        blocks = []
        for bi in range(nblocks):
            bcin = cin if bi == 0 else cout
            blk = {'w1': he((bcin, planes), bcin),
                   'w2': he((3, 3, planes, planes), 9 * planes),
                   'w3': he((planes, cout), planes)}
            blk['s1'], blk['b1'] = bn(planes)
            blk['s2'], blk['b2'] = bn(planes)
            blk['s3'], blk['b3'] = bn(cout, gain=0.25)     # keep residual growth bounded
            if bi == 0:
                blk['wd'] = he((bcin, cout), bcin)
                blk['sd'], blk['bd'] = bn(cout, gain=0.25)
                blk['w2f'] = blk['w2'].reshape(9 * planes, planes)   # pre-flattened for strided im2col
            blocks.append(blk)
        layers.append(blocks)
        cin = cout
    params['layers'] = layers

    params['fc1'] = (he((512 * _EXP, 1024), 512 * _EXP),
                     jnp.asarray(0.01 * rng.standard_normal((1, 1024), dtype=np.float32), F32))
    params['fc2'] = (he((1024, 136), 1024),
                     jnp.asarray(0.01 * rng.standard_normal((1, 136), dtype=np.float32), F32))
    return params


# ---------------------------------------------------------------------------
# TransferRes152 forward
# ---------------------------------------------------------------------------
def _downsample_block(x, blk, stride):
    """First bottleneck of a ResNet layer (projection shortcut, optional stride 2)."""
    xs = x if stride == 1 else x[:, ::stride, ::stride, :]
    r = conv1x1(xs, blk['wd'], blk['sd'], blk['bd'], relu=False)        # projection shortcut
    if stride == 1:
        return bottleneck_block(x, blk, residual=r)                     # fully fused, stride 1
    # strided main branch: 1x1 -> 3x3(s2, small im2col) -> 1x1 (+ shortcut fused in GEMM)
    y = conv1x1(x, blk['w1'], blk['s1'], blk['b1'], relu=True)
    Nb, H, W, Cmid = y.shape
    pat, (Ho, Wo) = _im2col(y, 3, stride, 1)
    y = gemm(pat, blk['w2f'], blk['s2'], blk['b2'], relu=True).reshape(Nb, Ho, Wo, Cmid)
    return conv1x1(y, blk['w3'], blk['s3'], blk['b3'], relu=True, residual=r)


def _layer(y, blocks, stride):
    y = _downsample_block(y, blocks[0], stride)
    Nb, H, W, C = y.shape
    yf = y.reshape(Nb, H * W, C)
    for blk in blocks[1:]:
        yf = bottleneck_flat(yf, H, W, blk)          # identity shortcut read inside the kernel
    return yf.reshape(Nb, H, W, C)


def transfer_res152_forward(x, params):
    """x: (N, 1, H, W) NCHW float32 -> (N, 136) float32."""
    N = x.shape[0]
    x = jnp.transpose(x, (0, 2, 3, 1)).astype(BF16)            # NCHW -> NHWC, (N, H, W, 1)

    # stem: 7x7/s2/p3 conv + BN + ReLU (channel repeat folded into the weight), then 3x3/s2 max pool
    w, s, b = params['stem']
    pat, (Ho, Wo) = _im2col(x, 7, 2, 3)
    y = gemm(pat, w, s, b, relu=True).reshape(N, Ho, Wo, 64)
    y = maxpool3x3s2(y)

    for li, blocks in enumerate(params['layers']):
        y = _layer(y, blocks, 1 if li == 0 else 2)

    # fused global-avg-pool + fc1 + ReLU + fc2 head   (== x.view(N,-1); F.relu(fc1(x)); fc2(x))
    return head(y, params['fc1'], params['fc2'])


# ---------------------------------------------------------------------------
if __name__ == "__main__":
    key = jax.random.PRNGKey(0)
    k1, k2, k3, k4, k5, k6 = jax.random.split(key, 6)
    hi = jax.lax.Precision.HIGHEST

    # --- GEMM (+ scale/shift/residual/ReLU) vs plain JAX ----------------------
    a = jax.random.normal(k1, (16, 40), F32).astype(BF16)
    wt = (0.2 * jax.random.normal(k2, (40, 24), F32)).astype(BF16)
    sc = 1.0 + 0.1 * jax.random.normal(k3, (1, 24), F32)
    sh = 0.1 * jax.random.normal(k4, (1, 24), F32)
    rr = jax.random.normal(k5, (16, 24), F32).astype(BF16)
    ref = jnp.maximum(jnp.dot(a.astype(F32), wt.astype(F32), precision=hi) * sc + sh
                      + rr.astype(F32), 0.0)
    got = gemm(a, wt, sc, sh, relu=True, residual=rr).astype(F32)
    assert bool(jnp.allclose(got, ref, atol=2e-2, rtol=2e-2))

    # --- 3x3/s2/p1 max pool vs lax.reduce_window ------------------------------
    xm = jax.random.normal(k6, (2, 8, 8, 16), F32).astype(BF16)
    ref_p = jax.lax.reduce_window(xm.astype(F32), jnp.array(-jnp.inf, F32), jax.lax.max,
                                  (1, 3, 3, 1), (1, 2, 2, 1),
                                  [(0, 0), (1, 1), (1, 1), (0, 0)])
    got_p = maxpool3x3s2(xm).astype(F32)
    assert got_p.shape == ref_p.shape
    assert bool(jnp.all(got_p == ref_p))

    # --- strided 3x3 conv (im2col path) vs lax.conv ----------------------------
    trng = np.random.default_rng(1)
    xc = jnp.asarray(trng.standard_normal((1, 6, 6, 8)).astype(np.float32), BF16)
    wc = jnp.asarray(0.2 * trng.standard_normal((3, 3, 8, 16)).astype(np.float32), BF16)
    pat_t, (ho, wo) = _im2col(xc, 3, 2, 1)
    got_c = gemm(pat_t, wc.reshape(72, 16), jnp.ones((1, 16), F32), jnp.zeros((1, 16), F32),
                 relu=False).reshape(1, ho, wo, 16).astype(F32)
    ref_c = jax.lax.conv_general_dilated(xc.astype(F32), wc.astype(F32), (2, 2),
                                         [(1, 1), (1, 1)],
                                         dimension_numbers=('NHWC', 'HWIO', 'NHWC'),
                                         precision=hi)
    assert bool(jnp.allclose(got_c, ref_c, atol=2e-2, rtol=2e-2))

    # --- fused bottleneck blocks vs plain JAX ------------------------------------
    def _make_blk(ci, cm, co, rng):
        blk = {'w1': jnp.asarray(0.3 * rng.standard_normal((ci, cm)).astype(np.float32), BF16),
               'w2': jnp.asarray(0.2 * rng.standard_normal((3, 3, cm, cm)).astype(np.float32), BF16),
               'w3': jnp.asarray(0.3 * rng.standard_normal((cm, co)).astype(np.float32), BF16)}
        for nm, c in (('1', cm), ('2', cm), ('3', co)):
            blk['s' + nm] = jnp.asarray(1.0 + 0.1 * rng.standard_normal((1, c)).astype(np.float32), F32)
            blk['b' + nm] = jnp.asarray(0.05 * rng.standard_normal((1, c)).astype(np.float32), F32)
        return blk

    def _ref_block(x, p, r):
        dn = ('NHWC', 'HWIO', 'NHWC')
        ci, cm = p['w1'].shape
        co = p['w3'].shape[1]
        y = jax.lax.conv_general_dilated(x.astype(F32), p['w1'].astype(F32).reshape(1, 1, ci, cm),
                                         (1, 1), 'VALID', dimension_numbers=dn, precision=hi)
        y = jnp.maximum(y * p['s1'] + p['b1'], 0.0).astype(BF16)
        y = jax.lax.conv_general_dilated(y.astype(F32), p['w2'].astype(F32),
                                         (1, 1), [(1, 1), (1, 1)], dimension_numbers=dn, precision=hi)
        y = jnp.maximum(y * p['s2'] + p['b2'], 0.0).astype(BF16)
        y = jax.lax.conv_general_dilated(y.astype(F32), p['w3'].astype(F32).reshape(1, 1, cm, co),
                                         (1, 1), 'VALID', dimension_numbers=dn, precision=hi)
        return jnp.maximum(y * p['s3'] + p['b3'] + r.astype(F32), 0.0)

    # identity shortcut (Cin == Cout), rectangular plane
    tb = _make_blk(32, 16, 32, trng)
    xb = jnp.asarray(0.5 * trng.standard_normal((2, 5, 6, 32)).astype(np.float32), BF16)
    got_b = bottleneck_block(xb, tb).astype(F32)
    ref_b = _ref_block(xb, tb, xb)
    assert bool(jnp.allclose(got_b, ref_b, atol=5e-2, rtol=5e-2))

    # identity shortcut, degenerate W == 1 plane (exercised by layer4 at 32x32 input)
    xb1 = jnp.asarray(0.5 * trng.standard_normal((2, 4, 1, 32)).astype(np.float32), BF16)
    got_b1 = bottleneck_block(xb1, tb).astype(F32)
    ref_b1 = _ref_block(xb1, tb, xb1)
    assert bool(jnp.allclose(got_b1, ref_b1, atol=5e-2, rtol=5e-2))

    # projection shortcut (Cin != Cout, separate residual input)
    pb = _make_blk(16, 8, 32, trng)
    xpb = jnp.asarray(0.5 * trng.standard_normal((2, 4, 4, 16)).astype(np.float32), BF16)
    rpb = jnp.asarray(0.5 * trng.standard_normal((2, 4, 4, 32)).astype(np.float32), BF16)
    got_pr = bottleneck_block(xpb, pb, residual=rpb).astype(F32)
    ref_pr = _ref_block(xpb, pb, rpb)
    assert bool(jnp.allclose(got_pr, ref_pr, atol=5e-2, rtol=5e-2))

    # --- fused avgpool + fc head vs plain JAX ------------------------------------
    xh = jnp.asarray(trng.standard_normal((2, 4, 64)).astype(np.float32), BF16)
    w1h = jnp.asarray(0.2 * trng.standard_normal((64, 32)).astype(np.float32), BF16)
    b1h = jnp.asarray(0.05 * trng.standard_normal((1, 32)).astype(np.float32), F32)
    w2h = jnp.asarray(0.2 * trng.standard_normal((32, 24)).astype(np.float32), BF16)
    b2h = jnp.asarray(0.05 * trng.standard_normal((1, 24)).astype(np.float32), F32)
    got_h = _head_fn(2, 4, 64, 32, 24)(xh, w1h, b1h, w2h, b2h)
    feat = xh.astype(F32).mean(axis=1)
    ref_h = jnp.maximum(feat @ w1h.astype(F32) + b1h, 0.0) @ w2h.astype(F32) + b2h
    assert bool(jnp.allclose(got_h, ref_h, atol=5e-2, rtol=5e-2))

    # --- full TransferRes152 forward (small input: batch=2, 1x32x32 grayscale) --
    params = init_params(0)
    x_in = jax.random.normal(jax.random.PRNGKey(0), (2, 1, 32, 32), F32)
    out = transfer_res152_forward(x_in, params)
    out = jax.block_until_ready(out)

    assert out.shape == (2, 136), out.shape
    assert bool(jnp.all(jnp.isfinite(out)))
    print("KERNEL_OK")
</pallas_src>

<mosaic_0001>
module attributes {stable_mosaic.version = 11 : i64} {
  func.func @_gemm_add_kernel(%arg0: i32, %arg1: memref<16x40xbf16, #tpu.memory_space<vmem>>, %arg2: memref<40x24xbf16, #tpu.memory_space<vmem>>, %arg3: memref<1x24xf32, #tpu.memory_space<vmem>>, %arg4: memref<1x24xf32, #tpu.memory_space<vmem>>, %arg5: memref<16x24xbf16, #tpu.memory_space<vmem>>, %arg6: memref<16x24xbf16, #tpu.memory_space<vmem>>) attributes {dimension_semantics = [#tpu.dimension_semantics<parallel>], iteration_bounds = array<i64: 1>, scalar_prefetch = 0 : i64, scratch_operands = 0 : i64, tpu.core_type = #tpu.core_type<tc>, window_params = [{transform_indices = @transform_0, window_bounds = array<i64: 16, 40>}, {pipeline_mode = #tpu.pipeline_mode<synchronous>, transform_indices = @transform_1, window_bounds = array<i64: 40, 24>}, {pipeline_mode = #tpu.pipeline_mode<synchronous>, transform_indices = @transform_2, window_bounds = array<i64: 1, 24>}, {pipeline_mode = #tpu.pipeline_mode<synchronous>, transform_indices = @transform_3, window_bounds = array<i64: 1, 24>}, {transform_indices = @transform_4, window_bounds = array<i64: 16, 24>}, {transform_indices = @transform_5, window_bounds = array<i64: 16, 24>}]} {
    %c0 = arith.constant 0 : index
    %c0_0 = arith.constant 0 : index
    %0 = vector.load %arg1[%c0, %c0_0] : memref<16x40xbf16, #tpu.memory_space<vmem>>, vector<16x40xbf16>
    %c0_1 = arith.constant 0 : index
    %c0_2 = arith.constant 0 : index
    %1 = vector.load %arg2[%c0_1, %c0_2] : memref<40x24xbf16, #tpu.memory_space<vmem>>, vector<40x24xbf16>
    %cst = arith.constant dense<0.000000e+00> : vector<16x24xf32>
    %2 = tpu.matmul %0, %1, %cst {dimension_numbers = #tpu.dot_dimension_numbers<[1], [0], [0], [1], [0, 0, 1, 1], [], []>} : vector<16x40xbf16>, vector<40x24xbf16>, vector<16x24xf32> -> vector<16x24xf32>
    %c0_3 = arith.constant 0 : index
    %c0_4 = arith.constant 0 : index
    %3 = vector.load %arg3[%c0_3, %c0_4] : memref<1x24xf32, #tpu.memory_space<vmem>>, vector<1x24xf32>
    %4 = vector.broadcast %3 : vector<1x24xf32> to vector<16x24xf32>
    %5 = arith.mulf %2, %4 : vector<16x24xf32>
    %c0_5 = arith.constant 0 : index
    %c0_6 = arith.constant 0 : index
    %6 = vector.load %arg4[%c0_5, %c0_6] : memref<1x24xf32, #tpu.memory_space<vmem>>, vector<1x24xf32>
    %7 = vector.broadcast %6 : vector<1x24xf32> to vector<16x24xf32>
    %8 = arith.addf %5, %7 : vector<16x24xf32>
    %c0_7 = arith.constant 0 : index
    %c0_8 = arith.constant 0 : index
    %9 = vector.load %arg5[%c0_7, %c0_8] : memref<16x24xbf16, #tpu.memory_space<vmem>>, vector<16x24xbf16>
    %10 = arith.extf %9 : vector<16x24xbf16> to vector<16x24xf32>
    %11 = arith.addf %8, %10 : vector<16x24xf32>
    %cst_9 = arith.constant 0.000000e+00 : f32
    %12 = vector.broadcast %cst_9 : f32 to vector<16x24xf32>
    %13 = arith.maximumf %11, %12 : vector<16x24xf32>
    %14 = arith.truncf %13 : vector<16x24xf32> to vector<16x24xbf16>
    %c0_10 = arith.constant 0 : index
    %c0_11 = arith.constant 0 : index
    %15 = vector.load %arg6[%c0_10, %c0_11] : memref<16x24xbf16, #tpu.memory_space<vmem>>, vector<16x24xbf16>
    tpu.vector_store %arg6[%c0_10, %c0_11], %14 {strides = array<i32>} : memref<16x24xbf16, #tpu.memory_space<vmem>>, vector<16x24xbf16>,
    return
  }
  func.func @transform_0(%arg0: i32) -> (i32, i32) {
    %c0_i32 = arith.constant 0 : i32
    %c0_i32_0 = arith.constant 0 : i32
    return %arg0, %c0_i32 : i32, i32
  }
  func.func @transform_1(%arg0: i32) -> (i32, i32) {
    %c0_i32 = arith.constant 0 : i32
    %c0_i32_0 = arith.constant 0 : i32
    %c0_i32_1 = arith.constant 0 : i32
    return %c0_i32, %c0_i32_0 : i32, i32
  }
  func.func @transform_2(%arg0: i32) -> (i32, i32) {
    %c0_i32 = arith.constant 0 : i32
    %c0_i32_0 = arith.constant 0 : i32
    %c0_i32_1 = arith.constant 0 : i32
    return %c0_i32, %c0_i32_0 : i32, i32
  }
  func.func @transform_3(%arg0: i32) -> (i32, i32) {
    %c0_i32 = arith.constant 0 : i32
    %c0_i32_0 = arith.constant 0 : i32
    %c0_i32_1 = arith.constant 0 : i32
    return %c0_i32, %c0_i32_0 : i32, i32
  }
  func.func @transform_4(%arg0: i32) -> (i32, i32) {
    %c0_i32 = arith.constant 0 : i32
    %c0_i32_0 = arith.constant 0 : i32
    return %arg0, %c0_i32 : i32, i32
  }
  func.func @transform_5(%arg0: i32) -> (i32, i32) {
    %c0_i32 = arith.constant 0 : i32
    %c0_i32_0 = arith.constant 0 : i32
    return %arg0, %c0_i32 : i32, i32
  }
}

</mosaic_0001>

<bundles_post_ra>
// kernel: tpu_custom_call.1
= control target key start
LH: loop header
LB: loop body
LE: loop exit
PB: predicated region body
PF: predicated region fallthrough
CT: control target
= control target key end

     0   :  { %v213_v1 = vmov 0.0   ;;  %vm214_vm0 = vmmov 0   ;;  %vm53_vm1 = vcmask 1043456   ;;  %s281_s0 = inlined_call_operand.vmem [shape: bf16[16,40], index: 0, kind: input, shape index: {}]   ;;  %s282_s1 = inlined_call_operand.vmem [shape: bf16[40,24], index: 1, kind: input, shape index: {}]   ;;  %s283_s2 = inlined_call_operand.vmem [shape: f32[1,24], index: 2, kind: input, shape index: {}]   ;;  %s284_s3 = inlined_call_operand.vmem [shape: f32[1,24], index: 3, kind: input, shape index: {}]   ;;  %s285_s4 = inlined_call_operand.vmem [shape: bf16[16,24], index: 4, kind: input, shape index: {}]   ;;  %s286_s5 = inlined_call_operand.hbm [shape: bf16[16,24], index: 5, kind: output, shape index: {}]  }
   0x1   :  { %v185_v0 = vld [vmem:[%s282_s1] sm:$0xff]   ;;  %170 = vmatprep.subr.bf16.mxu0 %v213_v1  ;;  %v186_v2 = vld [vmem:[%s282_s1 + $0x8] sm:$0xff]   ;;  %v187_v3 = vld [vmem:[%s282_s1 + $0x10] ss:$0 sps:$4 sm:$0xff]   ;;  %176 = vmatprep.mubr.msk.bf16.mxu0 %vm214_vm0, %v213_v1 }
   0x2   :  { %171 = vmatpush3.bf16.msra.mxu0 %v185_v0 }
   0x3   :  { %172 = vmatprep.subr.bf16.mxu0 %v213_v1 }
   0x4   :  { %10 = vsyncpa [#allocation3], 0  ;;  %v55_v4 = vsel %vm53_vm1, %v187_v3, 0  ;;  %v188_v5 = vld [vmem:[%s281_s0] sm:$0xff]   ;;  %vm49_vm2 = vcmask 326656   ;;  %s215_s0 = smov [#allocation2]  }
   0x5   :  { %v156_v6 = vld [vmem:[%s283_s2] ss:$0 sm:$0xff]  ;;  %s140_s2 = sshll.u32 %s215_s0, 4  ;;  %vm132_vm3 = vcmask 191488   ;;  %s141_s2 = int_to_ptr.vmem [resolvable:$true] %s140_s2 }
   0x6   :  { %173 = vmatpush3.bf16.msra.mxu0 %v186_v2  ;;  %v163_v7 = vld [vmem:[%s285_s4] sm:$0xff]   ;;  %p194_p1 = scmp.lt.s32.totalorder %s141_s2, %s141_s2 }
   0x7   :  { %174 = vmatprep.subr.bf16.mxu0 %v213_v1  ;;  %v157_v9 = vld [vmem:[%s284_s3] ss:$0 sm:$0xff]  ;;  %v164_v11 = vunpack.c.l.bf16 %v163_v7  ;;  %v165_v16 = vunpack.c.h.bf16 %v163_v7  ;;  %s189_s3 = scalar_lea.vmem %s141_s2, 128 }
   0x8   :  { %p190_p0 = scmp.ne.s32.totalorder %s141_s2, %s189_s3  ;;  %p195_p2 = scmp.lt.s32.totalorder %s189_s3, %s189_s3 }
   0xa   :  { %175 = vmatpush3.bf16.msra.mxu0 %v55_v4  ;;  %p196_p3 = por %p195_p2, %p194_p1 }
   0xc   :  { %p197_p4 = pnand %p196_p3, %p190_p0 }
   0xd   :  { %177 = vmatmul.mubr.msk.bf16.vlgmr.msra.gmra.mrb[0].mxu0 %vm49_vm2, %v188_v5 }
  0xe0   :  { %v91_v8 = vpop.f32.mrb[0].mxu0 }
  0xe1   :  { %v105_v10 = vmul.f32 %v156_v6, %v91_v8  ;;  %v178_v12 = vpop.f32.mrb[1].mxu0 }
  0xe2   :  { %v94_v13 = vpop.f32.mrb[2].mxu0 }
  0xe3   :  { %v114_v14 = vadd.f32 %v157_v9, %v105_v10  ;;  %v106_v15 = vmul.f32 %v156_v6, %v94_v13  ;;  %v179_v17 = vpop.f32.mrb[3].mxu0 }
  0xe5   :  { %v120_v18 = vadd.f32 %v164_v11, %v114_v14  ;;  %v115_v19 = vadd.f32 %v157_v9, %v106_v15 }
  0xe7   :  { %v122_v20 = vmax.f32 %v120_v18, 0.0  ;;  %v121_v21 = vadd.f32 %v165_v16, %v115_v19 }
  0xe9   :  { %v160_v22 = vpack.c.bf16 %v122_v20, %v122_v20  ;;  %v123_v23 = vmax.f32 %v121_v21, 0.0 }
  0xeb   :  { %133 = vst.msk [vmem:[#allocation2] sm:$0xf] %vm132_vm3, %v160_v22  ;;  %v161_v24 = vpack.c.bf16 %v123_v23, %v123_v23 }
  0xed   :  { %134 = vst.msk [vmem:[#allocation2 + $0x4] sm:$0xf] %vm132_vm3, %v161_v24 }
  0xee   :  { %200 = shalt.err (!%p197_p4)
}
  0xef   :  { %s201_s7 = scalar_lea.hbm %s286_s5, 128 }
  0xf0   :  { %p202_p5 = scmp.ne.s32.totalorder %s286_s5, %s201_s7  ;;  %p205_p6 = scmp.lt.u32.totalorder %s201_s7, %s286_s5 }
  0xf2   :  { %p207_p7 = pnand %p205_p6, %p202_p5 }
  0xf4   :  { %210 = shalt.err (!%p207_p7)
}
  0xf5   :  { %s216_s12 = smov 64   ;;  %s217_s13 = smov 4  }
  0xf6   :  { %146 = dma.vmem_to_hbm [thread:$0]  %s141_s2, 128, %s286_s5, [#allocation3], %s216_s12, %s216_s12, %s217_s13  }
  0xf7   :  { %211 = dma.done.wait [#allocation3], 128  }
  0xf8   :  { %212 = vsyncadd [#allocation3], 4294967168 }
  0xf9   :  { %150 = vsyncpa [#allocation3], 1 }

</bundles_post_ra>
